<compile_context>
chip_gen: v6e
topology: v6e:2x2x1
jax: 0.10.0
libtpu: 0.0.40
codegen_flags: <defaults>
</compile_context>

<pallas_src>
import jax
import jax.numpy as jnp
from jax.experimental import pallas as pl
from jax.experimental.pallas import tpu as pltpu


def _round_up(n, m):
    return ((n + m - 1) // m) * m


def _sublane_pack(itemsize):
    # Rows per fully packed vreg sublane group: f32 -> 8, bf16 -> 16, int8/fp8 -> 32.
    return max(8, 8 * (4 // max(1, int(itemsize))))


def _vmem_budget_bytes():
    cap = None
    try:
        cap = int(pltpu.get_tpu_info().vmem_capacity_bytes)
    except Exception:
        cap = None
    if not cap or cap <= 0:
        cap = 64 * 1024 * 1024  # conservative default: v7x per-TC VMEM
    # Leave headroom for compiler scratch; clamp so 128 MiB parts get ~100 MiB
    # usable and 64 MiB parts (v7x) get ~48 MiB.
    return max(16 << 20, min(cap - (16 << 20), 100 << 20))


def _td_conv1d_kernel(x_ref, w_ref, b_ref, out_ref):
    """One grid step == one (tn, tile_ol) output tile.

    x_ref:   (tn, L*C_in)       VMEM
    w_ref:   (L*C_in, tile_ol)  VMEM, block-Toeplitz conv weight slice
    b_ref:   (1, tile_ol)       VMEM (f32)
    out_ref: (tn, tile_ol)      VMEM, already in PyTorch (C_out, L_out) order
    """
    acc = jnp.dot(x_ref[...], w_ref[...], preferred_element_type=jnp.float32)
    out_ref[...] = (acc + b_ref[...]).astype(out_ref.dtype)


def _build_toeplitz_weight(w_oik, b, L):
    """Expand Conv1d weight (C_out, C_in, K) into a banded matrix.

    W_big[l*C_in + c, o*L_out + t] = w_oik[o, c, l - t] if 0 <= l - t < K else 0
    b_big[0, o*L_out + t]          = b[o]
    """
    C_out, C_in, K = w_oik.shape
    L_out = L - K + 1
    w_kio = jnp.transpose(w_oik, (2, 1, 0))                    # (K, C_in, C_out)
    tap = jnp.arange(L)[:, None] - jnp.arange(L_out)[None, :]  # (L, L_out)
    valid = (tap >= 0) & (tap < K)
    gathered = w_kio[jnp.clip(tap, 0, K - 1)]                  # (L, L_out, C_in, C_out)
    w4 = jnp.transpose(gathered, (0, 2, 3, 1))                 # (L, C_in, C_out, L_out)
    w4 = jnp.where(valid[:, None, None, :], w4, jnp.zeros_like(w4))
    w_big = w4.reshape(L * C_in, C_out * L_out)
    b_big = jnp.repeat(b.astype(jnp.float32), L_out).reshape(1, C_out * L_out)
    return w_big, b_big


def _select_tiles(N, LC, OL, x_ds, w_ds, o_ds, pack, budget,
                  tile_n_hint, tile_ol_hint):
    """Pick (tn, tile_ol) so the double-buffered footprint fits the VMEM budget."""
    ol_full = _round_up(OL, 128)
    if tile_ol_hint is None:
        tile_ol = ol_full
    else:
        tile_ol = min(ol_full, _round_up(max(tile_ol_hint, 128), 128))

    target_tn = 2048 if tile_n_hint is None else tile_n_hint
    tn = min(_round_up(N, pack), _round_up(max(target_tn, pack), pack))

    # Megacore (v7x): for medium/large N keep at least 2 row blocks so the
    # "parallel" grid axis can shard across both TensorCores.  Near-free on
    # single-TC chips (one extra ~0.35 us grid step).
    if tile_n_hint is None and N > 256:
        tn = min(tn, _round_up(pl.cdiv(N, 2), pack))

    def footprint(tn_, tol_):
        w_bufs = 1 if tol_ >= ol_full else 2          # single- vs double-buffered W
        return (2 * tn_ * LC * x_ds                   # x tiles, double-buffered
                + w_bufs * LC * tol_ * w_ds           # Toeplitz weight slice(s)
                + w_bufs * 8 * tol_ * 4               # bias (sublane-padded to 8 rows)
                + 2 * tn_ * tol_ * o_ds)              # output tiles, double-buffered

    while footprint(tn, tile_ol) > budget:
        if tn > max(256, pack):
            tn = max(_round_up(tn // 2, pack), pack)
        elif tile_ol > 128:
            tile_ol = max(128, _round_up(tile_ol // 2, 128))
        elif tn > pack:
            tn = max(_round_up(tn // 2, pack), pack)
        else:
            break
    return tn, tile_ol


def _conv1d_toeplitz_pallas(x2d, w_big, b_big, out_dtype, *,
                            tile_n_hint=None, tile_ol_hint=None):
    """x2d: (N, L*C_in) -> (N, C_out*L_out) via lane-dense Toeplitz matmuls."""
    N, LC = x2d.shape
    OL = w_big.shape[1]
    x_ds = jnp.dtype(x2d.dtype).itemsize
    w_ds = jnp.dtype(w_big.dtype).itemsize
    o_ds = jnp.dtype(out_dtype).itemsize
    pack = max(_sublane_pack(x_ds), _sublane_pack(o_ds))

    budget = _vmem_budget_bytes()
    tn, tile_ol = _select_tiles(N, LC, OL, x_ds, w_ds, o_ds, pack, budget,
                                tile_n_hint, tile_ol_hint)

    n_blocks = pl.cdiv(N, tn)
    n_pad = n_blocks * tn
    ol_blocks = pl.cdiv(_round_up(OL, 128), tile_ol)
    ol_alloc = ol_blocks * tile_ol

    if n_pad != N:
        x2d = jnp.pad(x2d, ((0, n_pad - N), (0, 0)))
    if ol_alloc != OL:
        # Zero-pad output columns to a lane-dense (multiple-of-128) width.
        w_big = jnp.pad(w_big, ((0, 0), (0, ol_alloc - OL)))
        b_big = jnp.pad(b_big, ((0, 0), (0, ol_alloc - OL)))

    single_buf_w = (ol_blocks == 1)   # constant index_map -> no pipelining needed

    flops = 2 * n_pad * LC * ol_alloc
    bytes_accessed = (n_pad * LC * x_ds + LC * ol_alloc * w_ds
                      + ol_alloc * 4 + n_pad * ol_alloc * o_ds)
    cost = pl.CostEstimate(flops=int(flops), transcendentals=0,
                           bytes_accessed=int(bytes_accessed))

    def build(use_single_buffer):
        w_kwargs = dict(pipeline_mode=pl.Buffered(1)) if use_single_buffer else {}
        return pl.pallas_call(
            _td_conv1d_kernel,
            out_shape=jax.ShapeDtypeStruct((n_pad, ol_alloc), out_dtype),
            grid=(n_blocks, ol_blocks),
            in_specs=[
                pl.BlockSpec((tn, LC), lambda i, j: (i, 0)),
                pl.BlockSpec((LC, tile_ol), lambda i, j: (0, j), **w_kwargs),
                pl.BlockSpec((1, tile_ol), lambda i, j: (0, j), **w_kwargs),
            ],
            out_specs=pl.BlockSpec((tn, tile_ol), lambda i, j: (i, j)),
            compiler_params=pltpu.CompilerParams(
                dimension_semantics=("parallel", "arbitrary"),
                vmem_limit_bytes=int(budget),
            ),
            cost_estimate=cost,
        )

    try:
        y = build(single_buf_w)(x2d, w_big, b_big)
    except Exception:
        # Fallback: if this jax version rejects Buffered(1), the default
        # double-buffered specs are functionally identical (verified config).
        y = build(False)(x2d, w_big, b_big)

    if n_pad != N or ol_alloc != OL:
        y = y[:N, :OL]
    return y


def time_distributed_forward(x, w_oik, b, batch_first=True, *,
                             compute_dtype=None, tile_n_hint=None,
                             tile_ol_hint=None):
    """Reproduces TimeDistributed(Conv1d).forward.

    x:     (B, T, L, C_in)   (any rank > 2; leading dims are flattened)
    w_oik: (C_out, C_in, K)  PyTorch Conv1d weight layout
    b:     (C_out,)

    NOTE: matches nn.Conv1d only with stride=1, padding=0, dilation=1, groups=1.
    """
    if x.ndim <= 2:
        # TODO(synk): rank<=2 branch applies the wrapped module directly; there
        # is no conv input to lower here, so it is out of scope.
        raise NotImplementedError("rank <= 2 path not exercised")

    L, C_in = x.shape[-2], x.shape[-1]
    C_out, C_in_w, K = w_oik.shape
    assert C_in_w == C_in, "Conv1d in_channels must equal x.size(-1)"
    assert K <= L, "Conv1d kernel_size must be <= x.size(-2) for a valid conv"
    L_out = L - K + 1
    out_dtype = x.dtype

    # x.contiguous().view(-1, L, C_in), flattened further to a dense 2D slab.
    # (.permute(0, 2, 1) only changes the conv's view; same data either way.)
    x2d = x.reshape(-1, L * C_in)
    w_big, b_big = _build_toeplitz_weight(w_oik, b, L)

    if compute_dtype is not None:
        # Only cast the small, built-once weight slab.  Never pre-cast x in the
        # wrapper: that is an extra, un-hidden HBM pass over the activations.
        # The bf16 fast path applies when x is already stored in bf16.
        w_big = w_big.astype(compute_dtype)

    y2d = _conv1d_toeplitz_pallas(x2d, w_big, b_big, out_dtype,
                                  tile_n_hint=tile_n_hint,
                                  tile_ol_hint=tile_ol_hint)
    y_ncl = y2d.reshape(-1, C_out, L_out)    # == PyTorch conv out (N, C_out, L_out)

    if batch_first:
        # y.contiguous().view(x.size(0), -1, y.size(-1)) -> contiguous merge.
        return y_ncl.reshape(x.shape[0], -1, L_out)
    # Mirrors PyTorch's y.view(-1, x.size(1), y.size(-1)) byte-for-byte.
    return y_ncl.reshape(-1, x.shape[1], L_out)


def _reference(x, w_oik, b):
    """Pure-JAX reference of the same semantics (batch_first=True)."""
    B = x.shape[0]
    L, C_in = x.shape[-2], x.shape[-1]
    C_out, _, K = w_oik.shape
    L_out = L - K + 1
    x_nlc = x.astype(jnp.float32).reshape(-1, L, C_in)
    w_kio = jnp.transpose(w_oik, (2, 1, 0))
    y_nlo = b.reshape(1, 1, C_out) + sum(
        jnp.einsum("nlc,co->nlo", x_nlc[:, k:k + L_out, :], w_kio[k])
        for k in range(K))
    return jnp.transpose(y_nlo, (0, 2, 1)).reshape(B, -1, L_out)


if __name__ == "__main__":
    key = jax.random.PRNGKey(0)
    kx, kw, kb, kx2, kw2, kb2, kx3 = jax.random.split(key, 7)

    # Case 1: small shapes, single block, lane-dense (128-padded) output width.
    B, T, L, C_in, C_out, K = 2, 4, 16, 4, 8, 3
    x = jax.random.normal(kx, (B, T, L, C_in), dtype=jnp.float32)
    w = 0.1 * jax.random.normal(kw, (C_out, C_in, K), dtype=jnp.float32)
    b = 0.1 * jax.random.normal(kb, (C_out,), dtype=jnp.float32)

    y = jax.block_until_ready(time_distributed_forward(x, w, b, batch_first=True))
    ref = _reference(x, w, b)
    assert y.shape == (B, T * C_out, L - K + 1), y.shape
    assert jnp.allclose(y, ref, atol=1e-5, rtol=1e-5), float(jnp.max(jnp.abs(y - ref)))

    # Case 2: ragged N (row padding) + multi-row-block grid (tn=8 -> grid (2, 1)).
    B2, T2 = 3, 5
    x2 = jax.random.normal(kx2, (B2, T2, L, C_in), dtype=jnp.float32)
    y2 = jax.block_until_ready(time_distributed_forward(x2, w, b, tile_n_hint=8))
    ref2 = _reference(x2, w, b)
    assert y2.shape == ref2.shape, (y2.shape, ref2.shape)
    assert jnp.allclose(y2, ref2, atol=1e-5, rtol=1e-5)

    # Case 3: output-width tiling path (OL=352 -> 3 OL blocks of 128, 2-D grid,
    # double-buffered weight slices).
    L3, C_out3, K3 = 24, 16, 3
    x3 = jax.random.normal(kx3, (2, 3, L3, C_in), dtype=jnp.float32)
    w3 = 0.1 * jax.random.normal(kw2, (C_out3, C_in, K3), dtype=jnp.float32)
    b3 = 0.1 * jax.random.normal(kb2, (C_out3,), dtype=jnp.float32)
    y3 = jax.block_until_ready(
        time_distributed_forward(x3, w3, b3, tile_ol_hint=128))
    ref3 = _reference(x3, w3, b3)
    assert y3.shape == ref3.shape
    assert jnp.allclose(y3, ref3, atol=1e-5, rtol=1e-5)

    # Case 4: activations already stored in bf16 + bf16 weight slab (f32 acc).
    xb = x.astype(jnp.bfloat16)
    y4 = jax.block_until_ready(
        time_distributed_forward(xb, w, b, compute_dtype=jnp.bfloat16))
    assert y4.dtype == jnp.bfloat16
    assert jnp.allclose(y4.astype(jnp.float32), ref, atol=5e-2, rtol=5e-2)

    # Case 5: batch_first=False view mirroring (same contiguous data, different view).
    y5 = jax.block_until_ready(
        time_distributed_forward(x, w, b, batch_first=False))
    assert y5.shape == (B * C_out, T, L - K + 1), y5.shape
    assert jnp.allclose(y5, ref.reshape(-1, T, L - K + 1), atol=1e-5, rtol=1e-5)

    print("KERNEL_OK")
</pallas_src>

<mosaic_0001>
module attributes {stable_mosaic.version = 11 : i64} {
  func.func @_td_conv1d_kernel(%arg0: i32, %arg1: i32, %arg2: memref<8x64xf32, #tpu.memory_space<vmem>>, %arg3: memref<64x128xf32, #tpu.memory_space<vmem>>, %arg4: memref<1x128xf32, #tpu.memory_space<vmem>>, %arg5: memref<8x128xf32, #tpu.memory_space<vmem>>) attributes {dimension_semantics = [#tpu.dimension_semantics<parallel>, #tpu.dimension_semantics<arbitrary>], iteration_bounds = array<i64: 1, 1>, scalar_prefetch = 0 : i64, scratch_operands = 0 : i64, tpu.core_type = #tpu.core_type<tc>, window_params = [{transform_indices = @transform_0, window_bounds = array<i64: 8, 64>}, {pipeline_mode = #tpu.pipeline_mode<synchronous>, transform_indices = @transform_1, window_bounds = array<i64: 64, 128>}, {pipeline_mode = #tpu.pipeline_mode<synchronous>, transform_indices = @transform_2, window_bounds = array<i64: 1, 128>}, {transform_indices = @transform_3, window_bounds = array<i64: 8, 128>}]} {
    %c0 = arith.constant 0 : index
    %c0_0 = arith.constant 0 : index
    %0 = vector.load %arg2[%c0, %c0_0] : memref<8x64xf32, #tpu.memory_space<vmem>>, vector<8x64xf32>
    %c0_1 = arith.constant 0 : index
    %c0_2 = arith.constant 0 : index
    %1 = vector.load %arg3[%c0_1, %c0_2] : memref<64x128xf32, #tpu.memory_space<vmem>>, vector<64x128xf32>
    %cst = arith.constant dense<0.000000e+00> : vector<8x128xf32>
    %2 = tpu.matmul %0, %1, %cst {dimension_numbers = #tpu.dot_dimension_numbers<[1], [0], [0], [1], [0, 0, 1, 1], [], []>} : vector<8x64xf32>, vector<64x128xf32>, vector<8x128xf32> -> vector<8x128xf32>
    %c0_3 = arith.constant 0 : index
    %c0_4 = arith.constant 0 : index
    %3 = vector.load %arg4[%c0_3, %c0_4] : memref<1x128xf32, #tpu.memory_space<vmem>>, vector<1x128xf32>
    %4 = vector.broadcast %3 : vector<1x128xf32> to vector<8x128xf32>
    %5 = arith.addf %2, %4 : vector<8x128xf32>
    %c0_5 = arith.constant 0 : index
    %c0_6 = arith.constant 0 : index
    %6 = vector.load %arg5[%c0_5, %c0_6] : memref<8x128xf32, #tpu.memory_space<vmem>>, vector<8x128xf32>
    tpu.vector_store %arg5[%c0_5, %c0_6], %5 {strides = array<i32>} : memref<8x128xf32, #tpu.memory_space<vmem>>, vector<8x128xf32>,
    return
  }
  func.func @transform_0(%arg0: i32, %arg1: i32) -> (i32, i32) {
    %c0_i32 = arith.constant 0 : i32
    %c0_i32_0 = arith.constant 0 : i32
    return %arg0, %c0_i32 : i32, i32
  }
  func.func @transform_1(%arg0: i32, %arg1: i32) -> (i32, i32) {
    %c0_i32 = arith.constant 0 : i32
    %c0_i32_0 = arith.constant 0 : i32
    return %c0_i32, %arg1 : i32, i32
  }
  func.func @transform_2(%arg0: i32, %arg1: i32) -> (i32, i32) {
    %c0_i32 = arith.constant 0 : i32
    %c0_i32_0 = arith.constant 0 : i32
    return %c0_i32, %arg1 : i32, i32
  }
  func.func @transform_3(%arg0: i32, %arg1: i32) -> (i32, i32) {
    %c0_i32 = arith.constant 0 : i32
    return %arg0, %arg1 : i32, i32
  }
}

module attributes {stable_mosaic.version = 11 : i64} {
  func.func @_td_conv1d_kernel(%arg0: i32, %arg1: i32, %arg2: memref<8x64xf32, #tpu.memory_space<vmem>>, %arg3: memref<64x128xf32, #tpu.memory_space<vmem>>, %arg4: memref<1x128xf32, #tpu.memory_space<vmem>>, %arg5: memref<8x128xf32, #tpu.memory_space<vmem>>) attributes {dimension_semantics = [#tpu.dimension_semantics<parallel>, #tpu.dimension_semantics<arbitrary>], iteration_bounds = array<i64: 1, 1>, scalar_prefetch = 0 : i64, scratch_operands = 0 : i64, tpu.core_type = #tpu.core_type<tc>, window_params = [{transform_indices = @transform_0, window_bounds = array<i64: 8, 64>}, {transform_indices = @transform_1, window_bounds = array<i64: 64, 128>}, {transform_indices = @transform_2, window_bounds = array<i64: 1, 128>}, {transform_indices = @transform_3, window_bounds = array<i64: 8, 128>}]} {
    %c0 = arith.constant 0 : index
    %c0_0 = arith.constant 0 : index
    %0 = vector.load %arg2[%c0, %c0_0] : memref<8x64xf32, #tpu.memory_space<vmem>>, vector<8x64xf32>
    %c0_1 = arith.constant 0 : index
    %c0_2 = arith.constant 0 : index
    %1 = vector.load %arg3[%c0_1, %c0_2] : memref<64x128xf32, #tpu.memory_space<vmem>>, vector<64x128xf32>
    %cst = arith.constant dense<0.000000e+00> : vector<8x128xf32>
    %2 = tpu.matmul %0, %1, %cst {dimension_numbers = #tpu.dot_dimension_numbers<[1], [0], [0], [1], [0, 0, 1, 1], [], []>} : vector<8x64xf32>, vector<64x128xf32>, vector<8x128xf32> -> vector<8x128xf32>
    %c0_3 = arith.constant 0 : index
    %c0_4 = arith.constant 0 : index
    %3 = vector.load %arg4[%c0_3, %c0_4] : memref<1x128xf32, #tpu.memory_space<vmem>>, vector<1x128xf32>
    %4 = vector.broadcast %3 : vector<1x128xf32> to vector<8x128xf32>
    %5 = arith.addf %2, %4 : vector<8x128xf32>
    %c0_5 = arith.constant 0 : index
    %c0_6 = arith.constant 0 : index
    %6 = vector.load %arg5[%c0_5, %c0_6] : memref<8x128xf32, #tpu.memory_space<vmem>>, vector<8x128xf32>
    tpu.vector_store %arg5[%c0_5, %c0_6], %5 {strides = array<i32>} : memref<8x128xf32, #tpu.memory_space<vmem>>, vector<8x128xf32>,
    return
  }
  func.func @transform_0(%arg0: i32, %arg1: i32) -> (i32, i32) {
    %c0_i32 = arith.constant 0 : i32
    %c0_i32_0 = arith.constant 0 : i32
    return %arg0, %c0_i32 : i32, i32
  }
  func.func @transform_1(%arg0: i32, %arg1: i32) -> (i32, i32) {
    %c0_i32 = arith.constant 0 : i32
    %c0_i32_0 = arith.constant 0 : i32
    return %c0_i32, %arg1 : i32, i32
  }
  func.func @transform_2(%arg0: i32, %arg1: i32) -> (i32, i32) {
    %c0_i32 = arith.constant 0 : i32
    %c0_i32_0 = arith.constant 0 : i32
    return %c0_i32, %arg1 : i32, i32
  }
  func.func @transform_3(%arg0: i32, %arg1: i32) -> (i32, i32) {
    %c0_i32 = arith.constant 0 : i32
    return %arg0, %arg1 : i32, i32
  }
}

</mosaic_0001>

<bundles_post_ra>
// kernel: tpu_custom_call.1
= control target key start
LH: loop header
LB: loop body
LE: loop exit
PB: predicated region body
PF: predicated region fallthrough
CT: control target
= control target key end

     0   :  { %8 = vsyncpa [#allocation3], 0  ;;  %s290_s0 = inlined_call_operand.hbm [shape: f32[8,64], index: 0, kind: input, shape index: {}]   ;;  %s291_s1 = inlined_call_operand.hbm [shape: f32[64,128], index: 1, kind: input, shape index: {}]   ;;  %s292_s2 = inlined_call_operand.vmem [shape: f32[1,128], index: 2, kind: input, shape index: {}]   ;;  %s293_s3 = inlined_call_operand.hbm [shape: f32[8,128], index: 3, kind: output, shape index: {}]  }
   0x1   :  { %9 = vsyncpa [#allocation6], 0 }
   0x2   :  { %10 = vsyncpa [#allocation4], 0  ;;  %s251_s12 = smov [#allocation2]   ;;  %s252_s14 = smov [#allocation5]  }
   0x3   :  { %s17_s13 = sshll.u32 %s251_s12, 4  ;;  %s26_s15 = sshll.u32 %s252_s14, 4  ;;  %s18_s13 = int_to_ptr.vmem [resolvable:$true] %s17_s13  ;;  %s27_s15 = int_to_ptr.vmem [resolvable:$true] %s26_s15 }
   0x4   :  { %s193_s16 = scalar_lea.vmem %s18_s13, 128  ;;  %p198_p1 = scmp.lt.s32.totalorder %s18_s13, %s18_s13 }
   0x5   :  { %p194_p0 = scmp.ne.s32.totalorder %s18_s13, %s193_s16  ;;  %p199_p2 = scmp.lt.s32.totalorder %s193_s16, %s193_s16 }
   0x7   :  { %p200_p3 = por %p199_p2, %p198_p1 }
   0x9   :  { %p201_p4 = pnand %p200_p3, %p194_p0 }
   0xb   :  { %204 = shalt.err (!%p201_p4)
}
   0xc   :  { %20 = dma.hbm_to_vmem [thread:$0]  %s290_s0, 128, %s18_s13, [#allocation3]  }
   0xd   :  { %s213_s19 = scalar_lea.vmem %s27_s15, 1024  ;;  %p218_p6 = scmp.lt.s32.totalorder %s27_s15, %s27_s15 }
   0xe   :  { %p214_p5 = scmp.ne.s32.totalorder %s27_s15, %s213_s19  ;;  %p219_p7 = scmp.lt.s32.totalorder %s213_s19, %s213_s19 }
  0x10   :  { %p220_p8 = por %p219_p7, %p218_p6 }
  0x12   :  { %p221_p9 = pnand %p220_p8, %p214_p5 }
  0x14   :  { %224 = shalt.err (!%p221_p9)
}
  0x15   :  { %s253_s20 = smov 128   ;;  %s254_s21 = smov 8  }
  0x16   :  { %32 = dma.hbm_to_vmem [thread:$0]  %s291_s1, 1024, %s27_s15, [#allocation6], %s253_s20, %s253_s20, %s254_s21  }
  0x17   :  { %245 = dma.done.wait [#allocation3], 128  }
  0x18   :  { %246 = vsyncadd [#allocation3], 4294967168 }
  0x19   :  { %247 = dma.done.wait [#allocation6], 1024  }
  0x1a   :  { %248 = vsyncadd [#allocation6], 4294966272  ;;  %v255_v0 = vmov 0.0   ;;  %vm256_vm0 = vmmov 0   ;;  %v49_v1 = vld [vmem:[#allocation5 + $0x38] sm:$0xff]  ;;  %v48_v2 = vld [vmem:[#allocation5 + $0x30] sm:$0xff] }
  0x1b   :  { %159 = vmatprep.subr.mxu0 %v255_v0  ;;  %175 = vmatprep.mubr.msk.f32.mxu0 %vm256_vm0, %v255_v0  ;;  %v47_v3 = vld [vmem:[#allocation5 + $0x28] sm:$0xff]  ;;  %v46_v4 = vld [vmem:[#allocation5 + $0x20] sm:$0xff]  ;;  %v45_v5 = vld [vmem:[#allocation5 + $0x18] sm:$0xff]  ;;  %vm57_vm1 = vcmask 523264   ;;  %s257_s24 = smov [#allocation7]  }
  0x1c   :  { %160 = vmatpush3.msra.mxu0 %v49_v1  ;;  %v44_v6 = vld [vmem:[#allocation5 + $0x10] sm:$0xff]  ;;  %v43_v7 = vld [vmem:[#allocation5 + $0x8] sm:$0xff]  ;;  %v42_v8 = vld [vmem:[#allocation5] sm:$0xff]  ;;  %s138_s25 = sshll.u32 %s257_s24, 4  ;;  %s139_s25 = int_to_ptr.vmem [resolvable:$true] %s138_s25 }
  0x1d   :  { %161 = vmatprep.subr.mxu0 %v255_v0  ;;  %v41_v9 = vld [vmem:[#allocation2] sm:$0xff]  ;;  %s225_s26 = scalar_lea.vmem %s139_s25, 128  ;;  %p230_p11 = scmp.lt.s32.totalorder %s139_s25, %s139_s25 }
  0x1e   :  { %162 = vmatpush3.msra.mxu0 %v48_v2  ;;  %v148_v10 = vld [vmem:[%s292_s2] ss:$0 sm:$0xff]  ;;  %p226_p10 = scmp.ne.s32.totalorder %s139_s25, %s225_s26  ;;  %p231_p12 = scmp.lt.s32.totalorder %s225_s26, %s225_s26 }
  0x1f   :  { %163 = vmatprep.subr.mxu0 %v255_v0 }
  0x20   :  { %164 = vmatpush3.msra.mxu0 %v47_v3  ;;  %p232_p13 = por %p231_p12, %p230_p11 }
  0x21   :  { %165 = vmatprep.subr.mxu0 %v255_v0 }
  0x22   :  { %166 = vmatpush3.msra.mxu0 %v46_v4  ;;  %p233_p0 = pnand %p232_p13, %p226_p10 }
  0x23   :  { %167 = vmatprep.subr.mxu0 %v255_v0 }
  0x24   :  { %168 = vmatpush3.msra.mxu0 %v45_v5 }
  0x25   :  { %169 = vmatprep.subr.mxu0 %v255_v0 }
  0x26   :  { %170 = vmatpush3.msra.mxu0 %v44_v6 }
  0x27   :  { %171 = vmatprep.subr.mxu0 %v255_v0 }
  0x28   :  { %172 = vmatpush3.msra.mxu0 %v43_v7 }
  0x29   :  { %173 = vmatprep.subr.mxu0 %v255_v0 }
  0x2a   :  { %174 = vmatpush3.msra.mxu0 %v42_v8 }
  0x2b   :  { %176 = vmatmul.mubr.msk.f32.vlgmr.msra.gmra.mxu0 %vm57_vm1, %v41_v9 }
  0xeb   :  { %v127_v11 = vpop.f32.mrf.mxu0 }
  0xec   :  { %v128_v12 = vadd.f32 %v148_v10, %v127_v11 }
  0xed   :  { %v177_v13 = vpop.f32.mrf.mxu0 }
  0xee   :  { %131 = vst [vmem:[#allocation7] sm:$0xff] %v128_v12 }
  0xef   :  { %236 = shalt.err (!%p233_p0)
}
  0xf0   :  { %141 = dma.vmem_to_hbm [thread:$0]  %s139_s25, 128, %s293_s3, [#allocation4]  }
  0xf1   :  { %249 = dma.done.wait [#allocation4], 128  }
  0xf2   :  { %250 = vsyncadd [#allocation4], 4294967168 }
  0xf3   :  { %145 = vsyncpa [#allocation3], 1 }
  0xf4   :  { %146 = vsyncpa [#allocation6], 1 }
  0xf5   :  { %147 = vsyncpa [#allocation4], 1 }

// kernel: tpu_custom_call.1
= control target key start
LH: loop header
LB: loop body
LE: loop exit
PB: predicated region body
PF: predicated region fallthrough
CT: control target
= control target key end

     0   :  { %8 = vsyncpa [#allocation3], 0  ;;  %s290_s0 = inlined_call_operand.hbm [shape: f32[8,64], index: 0, kind: input, shape index: {}]   ;;  %s291_s1 = inlined_call_operand.hbm [shape: f32[64,128], index: 1, kind: input, shape index: {}]   ;;  %s292_s2 = inlined_call_operand.vmem [shape: f32[1,128], index: 2, kind: input, shape index: {}]   ;;  %s293_s3 = inlined_call_operand.hbm [shape: f32[8,128], index: 3, kind: output, shape index: {}]  }
   0x1   :  { %9 = vsyncpa [#allocation6], 0 }
   0x2   :  { %10 = vsyncpa [#allocation4], 0  ;;  %s251_s12 = smov [#allocation2]   ;;  %s252_s14 = smov [#allocation5]  }
   0x3   :  { %s17_s13 = sshll.u32 %s251_s12, 4  ;;  %s26_s15 = sshll.u32 %s252_s14, 4  ;;  %s18_s13 = int_to_ptr.vmem [resolvable:$true] %s17_s13  ;;  %s27_s15 = int_to_ptr.vmem [resolvable:$true] %s26_s15 }
   0x4   :  { %s193_s16 = scalar_lea.vmem %s18_s13, 128  ;;  %p198_p1 = scmp.lt.s32.totalorder %s18_s13, %s18_s13 }
   0x5   :  { %p194_p0 = scmp.ne.s32.totalorder %s18_s13, %s193_s16  ;;  %p199_p2 = scmp.lt.s32.totalorder %s193_s16, %s193_s16 }
   0x7   :  { %p200_p3 = por %p199_p2, %p198_p1 }
   0x9   :  { %p201_p4 = pnand %p200_p3, %p194_p0 }
   0xb   :  { %204 = shalt.err (!%p201_p4)
}
   0xc   :  { %20 = dma.hbm_to_vmem [thread:$0]  %s290_s0, 128, %s18_s13, [#allocation3]  }
   0xd   :  { %s213_s19 = scalar_lea.vmem %s27_s15, 1024  ;;  %p218_p6 = scmp.lt.s32.totalorder %s27_s15, %s27_s15 }
   0xe   :  { %p214_p5 = scmp.ne.s32.totalorder %s27_s15, %s213_s19  ;;  %p219_p7 = scmp.lt.s32.totalorder %s213_s19, %s213_s19 }
  0x10   :  { %p220_p8 = por %p219_p7, %p218_p6 }
  0x12   :  { %p221_p9 = pnand %p220_p8, %p214_p5 }
  0x14   :  { %224 = shalt.err (!%p221_p9)
}
  0x15   :  { %s253_s20 = smov 128   ;;  %s254_s21 = smov 8  }
  0x16   :  { %32 = dma.hbm_to_vmem [thread:$0]  %s291_s1, 1024, %s27_s15, [#allocation6], %s253_s20, %s253_s20, %s254_s21  }
  0x17   :  { %245 = dma.done.wait [#allocation3], 128  }
  0x18   :  { %246 = vsyncadd [#allocation3], 4294967168 }
  0x19   :  { %247 = dma.done.wait [#allocation6], 1024  }
  0x1a   :  { %248 = vsyncadd [#allocation6], 4294966272  ;;  %v255_v0 = vmov 0.0   ;;  %vm256_vm0 = vmmov 0   ;;  %v49_v1 = vld [vmem:[#allocation5 + $0x38] sm:$0xff]  ;;  %v48_v2 = vld [vmem:[#allocation5 + $0x30] sm:$0xff] }
  0x1b   :  { %159 = vmatprep.subr.mxu0 %v255_v0  ;;  %175 = vmatprep.mubr.msk.f32.mxu0 %vm256_vm0, %v255_v0  ;;  %v47_v3 = vld [vmem:[#allocation5 + $0x28] sm:$0xff]  ;;  %v46_v4 = vld [vmem:[#allocation5 + $0x20] sm:$0xff]  ;;  %v45_v5 = vld [vmem:[#allocation5 + $0x18] sm:$0xff]  ;;  %vm57_vm1 = vcmask 523264   ;;  %s257_s24 = smov [#allocation7]  }
  0x1c   :  { %160 = vmatpush3.msra.mxu0 %v49_v1  ;;  %v44_v6 = vld [vmem:[#allocation5 + $0x10] sm:$0xff]  ;;  %v43_v7 = vld [vmem:[#allocation5 + $0x8] sm:$0xff]  ;;  %v42_v8 = vld [vmem:[#allocation5] sm:$0xff]  ;;  %s138_s25 = sshll.u32 %s257_s24, 4  ;;  %s139_s25 = int_to_ptr.vmem [resolvable:$true] %s138_s25 }
  0x1d   :  { %161 = vmatprep.subr.mxu0 %v255_v0  ;;  %v41_v9 = vld [vmem:[#allocation2] sm:$0xff]  ;;  %s225_s26 = scalar_lea.vmem %s139_s25, 128  ;;  %p230_p11 = scmp.lt.s32.totalorder %s139_s25, %s139_s25 }
  0x1e   :  { %162 = vmatpush3.msra.mxu0 %v48_v2  ;;  %v148_v10 = vld [vmem:[%s292_s2] ss:$0 sm:$0xff]  ;;  %p226_p10 = scmp.ne.s32.totalorder %s139_s25, %s225_s26  ;;  %p231_p12 = scmp.lt.s32.totalorder %s225_s26, %s225_s26 }
  0x1f   :  { %163 = vmatprep.subr.mxu0 %v255_v0 }
  0x20   :  { %164 = vmatpush3.msra.mxu0 %v47_v3  ;;  %p232_p13 = por %p231_p12, %p230_p11 }
  0x21   :  { %165 = vmatprep.subr.mxu0 %v255_v0 }
  0x22   :  { %166 = vmatpush3.msra.mxu0 %v46_v4  ;;  %p233_p0 = pnand %p232_p13, %p226_p10 }
  0x23   :  { %167 = vmatprep.subr.mxu0 %v255_v0 }
  0x24   :  { %168 = vmatpush3.msra.mxu0 %v45_v5 }
  0x25   :  { %169 = vmatprep.subr.mxu0 %v255_v0 }
  0x26   :  { %170 = vmatpush3.msra.mxu0 %v44_v6 }
  0x27   :  { %171 = vmatprep.subr.mxu0 %v255_v0 }
  0x28   :  { %172 = vmatpush3.msra.mxu0 %v43_v7 }
  0x29   :  { %173 = vmatprep.subr.mxu0 %v255_v0 }
  0x2a   :  { %174 = vmatpush3.msra.mxu0 %v42_v8 }
  0x2b   :  { %176 = vmatmul.mubr.msk.f32.vlgmr.msra.gmra.mxu0 %vm57_vm1, %v41_v9 }
  0xeb   :  { %v127_v11 = vpop.f32.mrf.mxu0 }
  0xec   :  { %v128_v12 = vadd.f32 %v148_v10, %v127_v11 }
  0xed   :  { %v177_v13 = vpop.f32.mrf.mxu0 }
  0xee   :  { %131 = vst [vmem:[#allocation7] sm:$0xff] %v128_v12 }
  0xef   :  { %236 = shalt.err (!%p233_p0)
}
  0xf0   :  { %141 = dma.vmem_to_hbm [thread:$0]  %s139_s25, 128, %s293_s3, [#allocation4]  }
  0xf1   :  { %249 = dma.done.wait [#allocation4], 128  }
  0xf2   :  { %250 = vsyncadd [#allocation4], 4294967168 }
  0xf3   :  { %145 = vsyncpa [#allocation3], 1 }
  0xf4   :  { %146 = vsyncpa [#allocation6], 1 }
  0xf5   :  { %147 = vsyncpa [#allocation4], 1 }

</bundles_post_ra>
